<compile_context>
chip_gen: v7x
topology: tpu7x:2x2x1
jax: 0.10.0
libtpu: 0.0.40
codegen_flags: <defaults>
</compile_context>

<pallas_src>
import functools
import math

import jax
import jax.numpy as jnp
import numpy as np
from jax import lax
from jax.experimental import pallas as pl
from jax.experimental.pallas import tpu as pltpu


# ----------------------------------------------------------------------------
# glue: patchify (pure reshapes/transposes, no compute)
# ----------------------------------------------------------------------------
def img_to_patch(x, patch_size):
    B, C, H, W = x.shape
    x = x.reshape(B, C, H // patch_size, patch_size, W // patch_size, patch_size)
    x = x.transpose(0, 2, 4, 1, 3, 5)
    x = x.reshape(B, (H // patch_size) * (W // patch_size),
                  C * patch_size * patch_size)
    return x


# ----------------------------------------------------------------------------
# Pallas kernel 1: patch embedding, row-tiled [B*T, P] @ [P, D]
# ----------------------------------------------------------------------------
def _embed_kernel(x_ref, w_ref, b_ref, o_ref):
    x = x_ref[...].astype(w_ref.dtype)        # cast activations at the dot
    o_ref[...] = (jnp.dot(x, w_ref[...], preferred_element_type=jnp.float32)
                  + b_ref[...])


def patch_embed(patches2d, w_t, b, block_m=512):
    M, P = patches2d.shape
    D = w_t.shape[1]
    bm = min(block_m, ((M + 7) // 8) * 8)
    M_pad = ((M + bm - 1) // bm) * bm
    if M_pad != M:
        patches2d = jnp.pad(patches2d, ((0, M_pad - M), (0, 0)))
    out = pl.pallas_call(
        _embed_kernel,
        out_shape=jax.ShapeDtypeStruct((M_pad, D), jnp.float32),
        grid=(M_pad // bm,),
        in_specs=[pl.BlockSpec((bm, P), lambda i: (i, 0)),
                  pl.BlockSpec((P, D), lambda i: (0, 0)),
                  pl.BlockSpec((1, D), lambda i: (0, 0))],
        out_specs=pl.BlockSpec((bm, D), lambda i: (i, 0)),
        compiler_params=pltpu.CompilerParams(
            dimension_semantics=("parallel",),
            vmem_limit_bytes=64 * 1024 * 1024),
    )(patches2d, w_t, b.reshape(1, D))
    return out[:M] if M_pad != M else out


# ----------------------------------------------------------------------------
# Pallas kernel 2: the transformer stack.
#   grid = (batch_tiles [parallel], num_layers [arbitrary])
#   activations: [bt, S_pad, D] f32 VMEM scratch, carried across the layer axis
#   weights:     stacked on a leading L axis, streamed per layer grid step
#   token order per image: [patches (T) | cls (1) | zero pad] so the output
#   write is exactly the first T (sublane-aligned) rows.
# ----------------------------------------------------------------------------
def _vit_stack_kernel(num_heads, s_valid,
                      emb_ref, pos_ref, tail_ref,
                      ln1w_ref, ln1b_ref, wqkv_ref, bqkv_ref, wo_ref, bo_ref,
                      ln2w_ref, ln2b_ref, w1_ref, b1_ref, w2_ref, b2_ref,
                      o_ref, x_ref):
    l = pl.program_id(1)
    bt, S_pad, D = x_ref.shape
    T = emb_ref.shape[1]
    H = num_heads
    hd = D // H
    M = bt * S_pad
    cdt = wqkv_ref.dtype                       # matmul compute dtype (bf16/f32)
    scale = 1.0 / math.sqrt(hd)
    eps = 1e-5

    # ---- prologue (layer 0 only): assemble tokens fully in VMEM ------------
    # cls + pos[0] was pre-folded host-side into `tail` (followed by zero rows).
    @pl.when(l == 0)
    def _():
        x_ref[:, 0:T, :] = emb_ref[...] + pos_ref[...][None]
        x_ref[:, T:S_pad, :] = jnp.broadcast_to(tail_ref[...][None],
                                                (bt, S_pad - T, D))

    def layer_norm(v, w, b):
        mu = jnp.mean(v, axis=-1, keepdims=True)
        var = jnp.mean(jnp.square(v - mu), axis=-1, keepdims=True)
        return (v - mu) * lax.rsqrt(var + eps) * w + b

    x = x_ref[...]                                            # [bt, S_pad, D] f32

    # key-padding mask: only the first s_valid keys of each image are real.
    kidx = lax.broadcasted_iota(jnp.int32, (1, S_pad), 1)
    mask = jnp.where(kidx < s_valid, 0.0, -1e30).astype(jnp.float32)  # [1, S_pad]

    # ---- attention: fused full-width QKV projection -------------------------
    xn = layer_norm(x, ln1w_ref[0], ln1b_ref[0])
    xn2d = xn.reshape(M, D).astype(cdt)
    qkv = jnp.dot(xn2d, wqkv_ref[0],
                  preferred_element_type=jnp.float32) + bqkv_ref[0]    # [M, 3D]

    # per-image scores [bt, S_pad, S_pad]; heads iterated statically (the
    # contraction / result widths are hd-wide regardless of batching; slices
    # are static lane slices of the VMEM-resident qkv tile).
    o_heads = []
    for h in range(H):
        qh = qkv[:, h * hd:(h + 1) * hd].reshape(bt, S_pad, hd).astype(cdt)
        kh = qkv[:, D + h * hd:D + (h + 1) * hd].reshape(bt, S_pad, hd).astype(cdt)
        vh = qkv[:, 2 * D + h * hd:2 * D + (h + 1) * hd].reshape(bt, S_pad, hd).astype(cdt)
        s = jnp.einsum('bqd,bkd->bqk', qh, kh,
                       preferred_element_type=jnp.float32) * scale + mask
        s = s - jnp.max(s, axis=-1, keepdims=True)
        p = jnp.exp(s)
        p = p * pl.reciprocal(jnp.sum(p, axis=-1, keepdims=True), approx=True)
        oh = jnp.einsum('bqk,bkd->bqd', p.astype(cdt), vh,
                        preferred_element_type=jnp.float32)
        o_heads.append(oh.reshape(M, hd))
    o2d = jnp.concatenate(o_heads, axis=-1)                   # [M, D] head concat

    # single full-width output projection
    attn = jnp.dot(o2d.astype(cdt), wo_ref[0],
                   preferred_element_type=jnp.float32) + bo_ref[0]
    x = x + attn.reshape(bt, S_pad, D)

    # ---- MLP (exact erf GELU, matching nn.GELU default) ---------------------
    xn2 = layer_norm(x, ln2w_ref[0], ln2b_ref[0])
    hidden = jnp.dot(xn2.reshape(M, D).astype(cdt), w1_ref[0],
                     preferred_element_type=jnp.float32) + b1_ref[0]
    hidden = 0.5 * hidden * (1.0 + lax.erf(hidden * (1.0 / math.sqrt(2.0))))
    y = jnp.dot(hidden.astype(cdt), w2_ref[0],
                preferred_element_type=jnp.float32) + b2_ref[0]
    x = x + y.reshape(bt, S_pad, D)

    x_ref[...] = x                                            # carry to next layer

    @pl.when(l == pl.num_programs(1) - 1)
    def _():
        o_ref[...] = x[:, 0:T, :]                             # patch tokens only


def _weight_spec(w):
    nd = w.ndim
    return pl.BlockSpec((1,) + w.shape[1:],
                        lambda i, l, _nd=nd: (l,) + (0,) * (_nd - 1))


def _pick_batch_tile(B, S_pad, D, Hid, H, vmem_budget=40 * 1024 * 1024):
    # Largest batch tile that (a) divides B, (b) leaves >= 2 grid steps on the
    # parallel axis (so v7x's two TensorCores both get work), (c) fits a rough
    # f32 intermediate budget (activations + qkv + scores + MLP hidden).
    best = 1
    for bt in range(1, B + 1):
        if B % bt:
            continue
        if B >= 2 and B // bt < 2:
            continue
        m = bt * S_pad
        est = 4 * (3 * m * D + 3 * m * D + bt * H * S_pad * S_pad + m * Hid)
        if est <= vmem_budget:
            best = bt
    return best


# ----------------------------------------------------------------------------
# full forward
# ----------------------------------------------------------------------------
def vision_transformer_forward(x, params, patch_size, num_heads,
                               compute_dtype=jnp.bfloat16):
    patches = img_to_patch(x, patch_size)                     # [B, T, P]
    B, T, P = patches.shape
    D = params["input_w"].shape[0]
    Hid = params["layers"][0]["fc1_w"].shape[0]
    L = len(params["layers"])
    H = num_heads
    assert D % H == 0, "embed_dim must be divisible by num_heads"
    S = T + 1
    S_pad = ((S + 7) // 8) * 8                                # sublane-align seq

    # --- patch embedding: row-tiled matmul, bf16 weight, f32 accumulate ---
    emb = patch_embed(patches.reshape(B * T, P),
                      params["input_w"].T.astype(compute_dtype),
                      params["input_b"])
    emb = emb.reshape(B, T, D)

    # --- cls + positional embedding fused into the stack kernel prologue ---
    # In-kernel token order: [patches | cls | zero pad].  Dropout(p=0.0) = id.
    pos = params["pos_embedding"][0]                          # [1+num_patches, D]
    pos_patches = pos[1:S]                                    # [T, D]
    cls_row = params["cls_token"].reshape(1, D) + pos[0:1]    # [1, D]
    tail = jnp.concatenate(
        [cls_row, jnp.zeros((S_pad - S, D), jnp.float32)], axis=0)  # [S_pad-T, D]

    bt = _pick_batch_tile(B, S_pad, D, Hid, H)
    grid = (B // bt, L)

    # --- per-layer weights stacked on a leading L axis, streamed per layer ---
    def stack(fn):
        return jnp.stack([fn(p) for p in params["layers"]])

    wdt = compute_dtype
    weights = [
        stack(lambda p: p["ln1_w"].reshape(1, D)),                     # f32
        stack(lambda p: p["ln1_b"].reshape(1, D)),
        stack(lambda p: p["qkv_w"].T.astype(wdt)),                     # [L, D, 3D]
        stack(lambda p: p["qkv_b"].reshape(1, 3 * D)),
        stack(lambda p: p["out_w"].T.astype(wdt)),                     # [L, D, D]
        stack(lambda p: p["out_b"].reshape(1, D)),
        stack(lambda p: p["ln2_w"].reshape(1, D)),
        stack(lambda p: p["ln2_b"].reshape(1, D)),
        stack(lambda p: p["fc1_w"].T.astype(wdt)),                     # [L, D, Hid]
        stack(lambda p: p["fc1_b"].reshape(1, Hid)),
        stack(lambda p: p["fc2_w"].T.astype(wdt)),                     # [L, Hid, D]
        stack(lambda p: p["fc2_b"].reshape(1, D)),
    ]

    kernel = functools.partial(_vit_stack_kernel, H, S)
    out = pl.pallas_call(
        kernel,
        out_shape=jax.ShapeDtypeStruct((B, T, D), jnp.float32),
        grid=grid,
        in_specs=[pl.BlockSpec((bt, T, D), lambda i, l: (i, 0, 0)),        # emb
                  pl.BlockSpec((T, D), lambda i, l: (0, 0)),               # pos
                  pl.BlockSpec((S_pad - T, D), lambda i, l: (0, 0))]       # cls+pad
                 + [_weight_spec(w) for w in weights],
        out_specs=pl.BlockSpec((bt, T, D), lambda i, l: (i, 0, 0)),
        scratch_shapes=[pltpu.VMEM((bt, S_pad, D), jnp.float32)],
        compiler_params=pltpu.CompilerParams(
            dimension_semantics=("parallel", "arbitrary"),
            vmem_limit_bytes=64 * 1024 * 1024),
    )(emb, pos_patches, tail, *weights)
    return out                                                 # [B, T, D]


# ----------------------------------------------------------------------------
# pure-JAX reference (for correctness check)
# ----------------------------------------------------------------------------
def _ref_block(x, p, num_heads):
    def ln(v, w, b):
        mu = v.mean(-1, keepdims=True)
        var = ((v - mu) ** 2).mean(-1, keepdims=True)
        return (v - mu) / jnp.sqrt(var + 1e-5) * w + b

    B, S, D = x.shape
    hd = D // num_heads
    xn = ln(x, p["ln1_w"], p["ln1_b"])
    qkv = xn @ p["qkv_w"].T + p["qkv_b"]
    q, k, v = jnp.split(qkv, 3, axis=-1)
    q = q.reshape(B, S, num_heads, hd).transpose(0, 2, 1, 3)
    k = k.reshape(B, S, num_heads, hd).transpose(0, 2, 1, 3)
    v = v.reshape(B, S, num_heads, hd).transpose(0, 2, 1, 3)
    s = (q / math.sqrt(hd)) @ k.transpose(0, 1, 3, 2)
    a = jax.nn.softmax(s, axis=-1)
    o = (a @ v).transpose(0, 2, 1, 3).reshape(B, S, D)
    x = x + o @ p["out_w"].T + p["out_b"]
    xn2 = ln(x, p["ln2_w"], p["ln2_b"])
    hid = jax.nn.gelu(xn2 @ p["fc1_w"].T + p["fc1_b"], approximate=False)
    return x + hid @ p["fc2_w"].T + p["fc2_b"]


def reference_forward(x, params, patch_size, num_heads):
    patches = img_to_patch(x, patch_size)
    B, T, _ = patches.shape
    D = params["input_w"].shape[0]
    h = patches @ params["input_w"].T + params["input_b"]
    cls = jnp.broadcast_to(params["cls_token"], (B, 1, D))
    h = jnp.concatenate([cls, h], axis=1)
    h = h + params["pos_embedding"][:, :T + 1]
    for layer in params["layers"]:
        h = _ref_block(h, layer, num_heads)
    return h[:, 1:, :]


# ----------------------------------------------------------------------------
# deterministic parameter init (shapes follow the PyTorch module)
# ----------------------------------------------------------------------------
def init_params(key, embed_dim, hidden_dim, num_channels, num_heads,
                num_layers, patch_size, num_patches):
    P = num_channels * patch_size ** 2
    keys = jax.random.split(key, 4 + num_layers)

    def dense(k, out_dim, in_dim, scale=0.05):
        return scale * jax.random.normal(k, (out_dim, in_dim), jnp.float32)

    def bias(k, dim, scale=0.02):
        return scale * jax.random.normal(k, (dim,), jnp.float32)

    params = {
        "input_w": dense(keys[0], embed_dim, P),
        "input_b": bias(jax.random.fold_in(keys[0], 1), embed_dim),
        "cls_token": jax.random.normal(keys[1], (1, 1, embed_dim), jnp.float32),
        "pos_embedding": jax.random.normal(
            keys[2], (1, 1 + num_patches, embed_dim), jnp.float32),
        "layers": [],
    }
    for i in range(num_layers):
        lk = jax.random.split(keys[3 + i], 8)
        params["layers"].append({
            "ln1_w": jnp.ones((embed_dim,), jnp.float32),
            "ln1_b": jnp.zeros((embed_dim,), jnp.float32),
            "qkv_w": dense(lk[0], 3 * embed_dim, embed_dim),
            "qkv_b": bias(lk[1], 3 * embed_dim),
            "out_w": dense(lk[2], embed_dim, embed_dim),
            "out_b": bias(lk[3], embed_dim),
            "ln2_w": jnp.ones((embed_dim,), jnp.float32),
            "ln2_b": jnp.zeros((embed_dim,), jnp.float32),
            "fc1_w": dense(lk[4], hidden_dim, embed_dim),
            "fc1_b": bias(lk[5], hidden_dim),
            "fc2_w": dense(lk[6], embed_dim, hidden_dim),
            "fc2_b": bias(lk[7], embed_dim),
        })
    return params


# ----------------------------------------------------------------------------
if __name__ == "__main__":
    key = jax.random.PRNGKey(0)
    B, C, Himg, Wimg = 2, 4, 16, 16
    patch_size = 4
    embed_dim, hidden_dim, num_heads, num_layers = 32, 64, 4, 2
    num_patches = (Himg // patch_size) * (Wimg // patch_size)   # 16

    kx, kp = jax.random.split(key)
    x = jax.random.normal(kx, (B, C, Himg, Wimg), jnp.float32)
    params = init_params(kp, embed_dim, hidden_dim, C, num_heads,
                         num_layers, patch_size, num_patches)

    ref = reference_forward(x, params, patch_size, num_heads)

    # f32 matmuls: tight check against the pure-JAX reference
    out_f32 = vision_transformer_forward(x, params, patch_size, num_heads,
                                         compute_dtype=jnp.float32)
    out_f32 = jax.block_until_ready(out_f32)
    assert out_f32.shape == (B, num_patches, embed_dim), out_f32.shape
    np.testing.assert_allclose(np.asarray(out_f32), np.asarray(ref),
                               atol=5e-3, rtol=5e-3)

    # bf16 matmul operands (production path): looser tolerance
    out_bf16 = vision_transformer_forward(x, params, patch_size, num_heads,
                                          compute_dtype=jnp.bfloat16)
    out_bf16 = jax.block_until_ready(out_bf16)
    np.testing.assert_allclose(np.asarray(out_bf16), np.asarray(ref),
                               atol=5e-2, rtol=5e-2)

    print("KERNEL_OK")
</pallas_src>

<mosaic_0001>
module attributes {stable_mosaic.version = 11 : i64} {
  func.func @_embed_kernel(%arg0: i32, %arg1: memref<32x64xf32, #tpu.memory_space<vmem>>, %arg2: memref<64x32xf32, #tpu.memory_space<vmem>>, %arg3: memref<1x32xf32, #tpu.memory_space<vmem>>, %arg4: memref<32x32xf32, #tpu.memory_space<vmem>>) attributes {dimension_semantics = [#tpu.dimension_semantics<parallel>], iteration_bounds = array<i64: 1>, scalar_prefetch = 0 : i64, scratch_operands = 0 : i64, tpu.core_type = #tpu.core_type<tc>, window_params = [{transform_indices = @transform_0, window_bounds = array<i64: 32, 64>}, {pipeline_mode = #tpu.pipeline_mode<synchronous>, transform_indices = @transform_1, window_bounds = array<i64: 64, 32>}, {pipeline_mode = #tpu.pipeline_mode<synchronous>, transform_indices = @transform_2, window_bounds = array<i64: 1, 32>}, {transform_indices = @transform_3, window_bounds = array<i64: 32, 32>}]} {
    %c0 = arith.constant 0 : index
    %c0_0 = arith.constant 0 : index
    %0 = vector.load %arg1[%c0, %c0_0] : memref<32x64xf32, #tpu.memory_space<vmem>>, vector<32x64xf32>
    %c0_1 = arith.constant 0 : index
    %c0_2 = arith.constant 0 : index
    %1 = vector.load %arg2[%c0_1, %c0_2] : memref<64x32xf32, #tpu.memory_space<vmem>>, vector<64x32xf32>
    %cst = arith.constant dense<0.000000e+00> : vector<32x32xf32>
    %2 = tpu.matmul %0, %1, %cst {dimension_numbers = #tpu.dot_dimension_numbers<[1], [0], [0], [1], [0, 0, 1, 1], [], []>} : vector<32x64xf32>, vector<64x32xf32>, vector<32x32xf32> -> vector<32x32xf32>
    %c0_3 = arith.constant 0 : index
    %c0_4 = arith.constant 0 : index
    %3 = vector.load %arg3[%c0_3, %c0_4] : memref<1x32xf32, #tpu.memory_space<vmem>>, vector<1x32xf32>
    %4 = vector.broadcast %3 : vector<1x32xf32> to vector<32x32xf32>
    %5 = arith.addf %2, %4 : vector<32x32xf32>
    %c0_5 = arith.constant 0 : index
    %c0_6 = arith.constant 0 : index
    %6 = vector.load %arg4[%c0_5, %c0_6] : memref<32x32xf32, #tpu.memory_space<vmem>>, vector<32x32xf32>
    tpu.vector_store %arg4[%c0_5, %c0_6], %5 {strides = array<i32>} : memref<32x32xf32, #tpu.memory_space<vmem>>, vector<32x32xf32>,
    return
  }
  func.func @transform_0(%arg0: i32) -> (i32, i32) {
    %c0_i32 = arith.constant 0 : i32
    %c0_i32_0 = arith.constant 0 : i32
    return %arg0, %c0_i32 : i32, i32
  }
  func.func @transform_1(%arg0: i32) -> (i32, i32) {
    %c0_i32 = arith.constant 0 : i32
    %c0_i32_0 = arith.constant 0 : i32
    %c0_i32_1 = arith.constant 0 : i32
    return %c0_i32, %c0_i32_0 : i32, i32
  }
  func.func @transform_2(%arg0: i32) -> (i32, i32) {
    %c0_i32 = arith.constant 0 : i32
    %c0_i32_0 = arith.constant 0 : i32
    %c0_i32_1 = arith.constant 0 : i32
    return %c0_i32, %c0_i32_0 : i32, i32
  }
  func.func @transform_3(%arg0: i32) -> (i32, i32) {
    %c0_i32 = arith.constant 0 : i32
    %c0_i32_0 = arith.constant 0 : i32
    return %arg0, %c0_i32 : i32, i32
  }
}

</mosaic_0001>

<bundles_post_ra>
// kernel: tpu_custom_call.1
= control target key start
LH: loop header
LB: loop body
LE: loop exit
PB: predicated region body
PF: predicated region fallthrough
CT: control target
= control target key end

     0   :  { %8 = vsyncpa [#allocation3], 0  ;;  %s451_s0 = inlined_call_operand.hbm [shape: f32[32,64], index: 0, kind: input, shape index: {}]   ;;  %s452_s1 = inlined_call_operand.hbm [shape: f32[64,32], index: 1, kind: input, shape index: {}]   ;;  %s453_s2 = inlined_call_operand.hbm [shape: f32[1,32], index: 2, kind: input, shape index: {}]   ;;  %s454_s3 = inlined_call_operand.hbm [shape: f32[32,32], index: 3, kind: output, shape index: {}]  }
   0x1   :  { %9 = vsyncpa [#allocation6], 0 }
   0x2   :  { %10 = vsyncpa [#allocation4], 0  ;;  %s357_s12 = smov [#allocation5]   ;;  %s358_s14 = smov [#allocation2]  }
   0x3   :  { %s28_s13 = sshll.u32 %s357_s12, 4  ;;  %s16_s15 = sshll.u32 %s358_s14, 4  ;;  %s29_s13 = int_to_ptr.vmem [resolvable:$true] %s28_s13  ;;  %s383_s15 = int_to_ptr.vmem [resolvable:$true] %s16_s15 }
   0x4   :  { %s263_s18 = scalar_lea.hbm %s452_s1, 1024 }
   0x5   :  { %p264_p0 = scmp.ne.s32.totalorder %s452_s1, %s263_s18  ;;  %p267_p1 = scmp.lt.u32.totalorder %s263_s18, %s452_s1 }
   0x7   :  { %p269_p2 = pnand %p267_p1, %p264_p0 }
   0x9   :  { %272 = shalt.err (!%p269_p2)
}
   0xa   :  { %s273_s23 = scalar_lea.vmem %s29_s13, 1024  ;;  %p278_p4 = scmp.lt.s32.totalorder %s29_s13, %s29_s13 }
   0xb   :  { %p274_p3 = scmp.ne.s32.totalorder %s29_s13, %s273_s23  ;;  %p279_p5 = scmp.lt.s32.totalorder %s273_s23, %s273_s23 }
   0xd   :  { %p280_p6 = por %p279_p5, %p278_p4 }
   0xf   :  { %p281_p7 = pnand %p280_p6, %p274_p3 }
  0x11   :  { %284 = shalt.err (!%p281_p7)
}
  0x12   :  { %s359_s24 = smov 128   ;;  %s360_s25 = smov 8  }
  0x13   :  { %34 = dma.hbm_to_vmem [thread:$0]  %s452_s1, 1024, %s29_s13, [#allocation6], %s359_s24, %s359_s24, %s360_s25  }
  0x14   :  { %s285_s30 = scalar_lea.hbm %s451_s0, 512 }
  0x15   :  { %p286_p8 = scmp.ne.s32.totalorder %s451_s0, %s285_s30  ;;  %p289_p9 = scmp.lt.u32.totalorder %s285_s30, %s451_s0 }
  0x17   :  { %p291_p10 = pnand %p289_p9, %p286_p8 }
  0x19   :  { %294 = shalt.err (!%p291_p10)
}
  0x1a   :  { %s295_s8 = scalar_lea.vmem %s383_s15, 512  ;;  %p300_p12 = scmp.lt.s32.totalorder %s383_s15, %s383_s15 }
  0x1b   :  { %p296_p11 = scmp.ne.s32.totalorder %s383_s15, %s295_s8  ;;  %p301_p13 = scmp.lt.s32.totalorder %s295_s8, %s295_s8 }
  0x1d   :  { %p302_p0 = por %p301_p13, %p300_p12 }
  0x1f   :  { %p303_p1 = pnand %p302_p0, %p296_p11 }
  0x21   :  { %306 = shalt.err (!%p303_p1)
}
  0x22   :  { %22 = dma.hbm_to_vmem [thread:$0]  %s451_s0, 512, %s383_s15, [#allocation3], %s359_s24, %s359_s24, %s360_s25  }
  0x23   :  { %s361_s10 = smov [#allocation7]   ;;  %s307_s14 = scalar_lea.hbm %s453_s2, 16 }
  0x24   :  { %s41_s11 = sshll.u32 %s361_s10, 4  ;;  %p308_p2 = scmp.ne.s32.totalorder %s453_s2, %s307_s14  ;;  %s42_s11 = int_to_ptr.vmem [resolvable:$true] %s41_s11 }
  0x25   :  { %p311_p3 = scmp.lt.u32.totalorder %s307_s14, %s453_s2 }
  0x27   :  { %p313_p4 = pnand %p311_p3, %p308_p2 }
  0x29   :  { %316 = shalt.err (!%p313_p4)
}
  0x2a   :  { %s317_s20 = scalar_lea.vmem %s42_s11, 16  ;;  %s321_s0 = scalar_lea.vmem %s42_s11, 32 }
  0x2b   :  { %p318_p5 = scmp.ne.s32.totalorder %s42_s11, %s317_s20  ;;  %p322_p6 = scmp.lt.s32.totalorder %s42_s11, %s42_s11 }
  0x2c   :  { %p323_p7 = scmp.lt.s32.totalorder %s321_s0, %s317_s20 }
  0x2e   :  { %p324_p8 = por %p323_p7, %p322_p6 }
  0x30   :  { %p325_p9 = pnand %p324_p8, %p318_p5 }
  0x32   :  { %328 = shalt.err (!%p325_p9)
}
  0x33   :  { %44 = dma.hbm_to_vmem [thread:$0]  %s453_s2, 16, %s42_s11, [#allocation6]  }
  0x34   :  { %351 = dma.done.wait [#allocation3], 512  }
  0x35   :  { %352 = vsyncadd [#allocation3], 4294966784 }
  0x36   :  { %353 = dma.done.wait [#allocation6], 1040  }
  0x37   :  { %354 = vsyncadd [#allocation6], 4294966256  ;;  %v58_v0 = vld [vmem:[#allocation5] sm:$0xff]  ;;  %v59_v1 = vld [vmem:[#allocation5 + $0x8] sm:$0xff]  ;;  %vm73_vm0 = vcmask 523264   ;;  %s362_s2 = smov [#allocation8]  }
  0x38   :  { %v60_v2 = vld [vmem:[#allocation5 + $0x10] sm:$0xff]  ;;  %v233_v3 = vpack.c.bf16 %v59_v1, %v58_v0  ;;  %v61_v4 = vld [vmem:[#allocation5 + $0x18] sm:$0xff]  ;;  %v62_v6 = vld [vmem:[#allocation5 + $0x20] sm:$0xff]  ;;  %s181_s22 = sshll.u32 %s362_s2, 4  ;;  %vm171_vm1 = vcmask 261120   ;;  %s182_s22 = int_to_ptr.vmem [resolvable:$true] %s181_s22 }
  0x39   :  { %v237_v5 = vpack.c.bf16 %v61_v4, %v60_v2  ;;  %v63_v7 = vld [vmem:[#allocation5 + $0x28] sm:$0xff]  ;;  %v54_v8 = vld [vmem:[#allocation2] sm:$0xff]  ;;  %v56_v9 = vld [vmem:[#allocation2 + $0x10] sm:$0xff]  ;;  %s329_s23 = scalar_lea.vmem %s182_s22, 512  ;;  %p334_p11 = scmp.lt.s32.totalorder %s182_s22, %s182_s22 }
  0x3a   :  { %234 = vmatprep.subr.bf16.mxu0 %v233_v3  ;;  %249 = vmatprep.subr.bf16.mxu1 %v233_v3  ;;  %v241_v10 = vpack.c.bf16 %v63_v7, %v62_v6  ;;  %v64_v11 = vld [vmem:[#allocation5 + $0x30] sm:$0xff]  ;;  %v65_v12 = vld [vmem:[#allocation5 + $0x38] sm:$0xff]  ;;  %v55_v14 = vld [vmem:[#allocation2 + $0x8] sm:$0xff]  ;;  %p330_p10 = scmp.ne.s32.totalorder %s182_s22, %s329_s23  ;;  %p335_p12 = scmp.lt.s32.totalorder %s329_s23, %s329_s23 }
  0x3b   :  { %236 = vmatpush3.bf16.msra.mxu0 %v233_v3  ;;  %253 = vmatpush3.bf16.msra.mxu1 %v233_v3  ;;  %v245_v13 = vpack.c.bf16 %v65_v12, %v64_v11  ;;  %v57_v15 = vld [vmem:[#allocation2 + $0x18] sm:$0xff]  ;;  %v194_v16 = vld [vmem:[#allocation7] ss:$0 sm:$0xff] }
  0x3c   :  { %238 = vmatprep.subr.bf16.mxu0 %v237_v5  ;;  %250 = vmatprep.subr.bf16.mxu1 %v237_v5  ;;  %p336_p13 = por %p335_p12, %p334_p11 }
  0x3d   :  { %227 = vmatprep.mubr.msk.f32.mxu0 %vm73_vm0, %v54_v8  ;;  %230 = vmatprep.mubr.msk.f32.mxu1 %vm73_vm0, %v56_v9 }
  0x3e   :  { %p337_p0 = pnand %p336_p13, %p330_p10 }
  0x3f   :  { %240 = vmatpush3.bf16.msra.mxu0 %v237_v5  ;;  %254 = vmatpush3.bf16.msra.mxu1 %v237_v5 }
  0x40   :  { %242 = vmatprep.subr.bf16.mxu0 %v241_v10  ;;  %251 = vmatprep.subr.bf16.mxu1 %v241_v10 }
  0x43   :  { %244 = vmatpush3.bf16.msra.mxu0 %v241_v10  ;;  %255 = vmatpush3.bf16.msra.mxu1 %v241_v10 }
  0x44   :  { %246 = vmatprep.subr.bf16.mxu0 %v245_v13  ;;  %252 = vmatprep.subr.bf16.mxu1 %v245_v13 }
  0x47   :  { %248 = vmatpush3.bf16.msra.mxu0 %v245_v13  ;;  %256 = vmatpush3.bf16.msra.mxu1 %v245_v13 }
  0x4a   :  { %228 = vmatmul.mubr.msk.f32.vlgmr.msra.gmra.mrb[0].mxu0 %vm73_vm0, %v55_v14  ;;  %231 = vmatmul.mubr.msk.f32.vlgmr.msra.gmra.mrb[0].mxu1 %vm73_vm0, %v57_v15 }
 0x11d   :  { %v229_v17 = vpop.f32.mrb[0].mxu0  ;;  %v232_v18 = vpop.f32.mrb[0].mxu1 }
 0x11e   :  { %v158_v19 = vadd.f32 %v229_v17, %v194_v16  ;;  %v168_v20 = vadd.f32 %v232_v18, %v194_v16  ;;  %v152_v21 = vpop.f32.mrb[1].mxu0  ;;  %v162_v22 = vpop.f32.mrb[1].mxu1 }
 0x11f   :  { %v153_v23 = vadd.f32 %v194_v16, %v152_v21  ;;  %v163_v24 = vadd.f32 %v194_v16, %v162_v22 }
 0x120   :  { %173 = vst.msk [vmem:[#allocation8 + $0x8] sm:$0xff] %vm171_vm1, %v158_v19  ;;  %175 = vst.msk [vmem:[#allocation8 + $0x18] sm:$0xff] %vm171_vm1, %v168_v20 }
 0x121   :  { %172 = vst.msk [vmem:[#allocation8] sm:$0xff] %vm171_vm1, %v153_v23  ;;  %174 = vst.msk [vmem:[#allocation8 + $0x10] sm:$0xff] %vm171_vm1, %v163_v24 }
 0x122   :  { %340 = shalt.err (!%p337_p0)
}
 0x123   :  { %s341_s28 = scalar_lea.hbm %s454_s3, 512 }
 0x124   :  { %p342_p1 = scmp.ne.s32.totalorder %s454_s3, %s341_s28  ;;  %p345_p2 = scmp.lt.u32.totalorder %s341_s28, %s454_s3 }
 0x126   :  { %p347_p3 = pnand %p345_p2, %p342_p1 }
 0x128   :  { %350 = shalt.err (!%p347_p3)
}
 0x129   :  { %187 = dma.vmem_to_hbm [thread:$0]  %s182_s22, 512, %s454_s3, [#allocation4], %s359_s24, %s359_s24, %s360_s25  }
 0x12a   :  { %355 = dma.done.wait [#allocation4], 512  }
 0x12b   :  { %356 = vsyncadd [#allocation4], 4294966784 }
 0x12c   :  { %191 = vsyncpa [#allocation3], 1 }
 0x12d   :  { %192 = vsyncpa [#allocation6], 1 }
 0x12e   :  { %193 = vsyncpa [#allocation4], 1 }

</bundles_post_ra>
